<compile_context>
chip_gen: v7x
topology: tpu7x:2x2x1
jax: 0.10.0
libtpu: 0.0.40
codegen_flags: <defaults>
</compile_context>

<pallas_src>
import jax
import jax.numpy as jnp
from jax import lax
from jax.experimental import pallas as pl
from jax.experimental.pallas import tpu as pltpu


def _round_up(x: int, m: int) -> int:
    return (x + m - 1) // m * m


def _divisor_tiles(dim_padded: int, max_tile: int):
    """Multiples of 128 (ascending) that divide `dim_padded`, capped at max_tile."""
    hi = min(dim_padded, max_tile)
    return [d for d in range(128, hi + 1, 128) if dim_padded % d == 0]


def _vmem_capacity_bytes() -> int:
    try:
        info = pltpu.get_tpu_info()
        cap = getattr(info, "vmem_capacity_bytes", None)
        if cap:
            return int(cap)
    except Exception:
        pass
    return 64 * 1024 * 1024  # conservative default (v7x per-core VMEM)


def _linear_kernel(x_ref, w_ref, b_ref, o_ref, acc_ref):
    """One (tm, tn) output tile; K (embedding) is the last, reduced grid axis.

    x_ref: (tm, tk), w_ref: (tn, tk) in native [C, E] layout, b_ref: (1, tn).
    """
    k = pl.program_id(2)

    # x @ w.T on the MXU: contract the last dim of both operands.
    prod = lax.dot_general(
        x_ref[...],
        w_ref[...],
        dimension_numbers=(((1,), (1,)), ((), ())),
        preferred_element_type=jnp.float32,
    )

    @pl.when(k == 0)
    def _():
        # First K step: write dot + bias directly (no zero-init, no final add).
        acc_ref[...] = prod + b_ref[...].astype(jnp.float32)

    @pl.when(k > 0)
    def _():
        acc_ref[...] += prod

    @pl.when(k == pl.num_programs(2) - 1)
    def _():
        o_ref[...] = acc_ref[...].astype(o_ref.dtype)


def classification_head(x, weight, bias, *, tile_m=None, tile_n=None, tile_k=None):
    """nn.Linear forward.  x: [B, E]; weight: [C, E] (PyTorch layout); bias: [C]."""
    B, E = x.shape
    C, E_w = weight.shape
    assert E == E_w, "weight / input embedding size mismatch"

    out_dtype = x.dtype
    x_isz = jnp.dtype(x.dtype).itemsize
    w_isz = jnp.dtype(weight.dtype).itemsize
    b_isz = jnp.dtype(bias.dtype).itemsize
    o_isz = jnp.dtype(out_dtype).itemsize
    sublane = {4: 8, 2: 16, 1: 32}.get(x_isz, 8)

    # ---- 128 / sublane aligned problem sizes --------------------------------
    Bp = _round_up(B, sublane)
    Ep = _round_up(E, 128)   # K: lanes of x block, lanes of W block
    Cp = _round_up(C, 128)   # N: lane-dense output stores

    # ---- per-generation VMEM budget -----------------------------------------
    vmem_cap = _vmem_capacity_bytes()
    vmem_budget = min((vmem_cap * 3) // 4, 100 * 1024 * 1024)  # ~48 MiB v7x, ~96 MiB v5e/v6e

    def usage(tm, tn, tk):
        # double-buffered input/output blocks + f32 accumulator scratch
        return (2 * tm * tk * x_isz
                + 2 * tn * tk * w_isz
                + 2 * tn * b_isz
                + 2 * tm * tn * o_isz
                + tm * tn * 4)

    # ---- tile_m: whole (padded) batch when small, else minimize M padding ----
    if tile_m is None:
        if Bp <= 512:
            tile_m = Bp
        else:
            tile_m = min((512, 384, 256, 128),
                         key=lambda t: (_round_up(Bp, t), -t))
    else:
        tile_m = _round_up(max(int(tile_m), sublane), sublane)
    Bp = _round_up(Bp, tile_m)

    # ---- tile_n: largest 128-multiple divisor of Cp, <= 512 as a baseline ----
    auto_n = tile_n is None
    if auto_n:
        tile_n = max(d for d in _divisor_tiles(Cp, Cp) if d <= 512)
    else:
        tile_n = _round_up(max(int(tile_n), 128), 128)
        Cp = _round_up(Cp, tile_n)

    # ---- tile_k: largest 128-multiple divisor of Ep that fits the budget -----
    auto_k = tile_k is None
    if auto_k:
        tile_k = 128
        for d in _divisor_tiles(Ep, Ep):
            if usage(tile_m, tile_n, d) <= vmem_budget:
                tile_k = d
    else:
        tile_k = _round_up(max(int(tile_k), 128), 128)
        Ep = _round_up(Ep, tile_k)

    # ---- grow tile_n into remaining VMEM (bigger weight DMAs, fewer steps) ---
    if auto_n:
        for d in _divisor_tiles(Cp, 1024):
            if d > tile_n and usage(tile_m, d, tile_k) <= vmem_budget:
                tile_n = d

    # ---- v7x megacore: guarantee >= 2 parallel (M, N) tiles ------------------
    if auto_n and (Bp // tile_m) * (Cp // tile_n) == 1:
        smaller = [d for d in _divisor_tiles(Cp, Cp) if d < Cp]
        if smaller:
            tile_n = max(smaller)

    grid = (Bp // tile_m, Cp // tile_n, Ep // tile_k)

    # ---- pad operands only when actually needed (zeros along K are exact) ----
    if (Bp, Ep) != (B, E):
        xp = jnp.zeros((Bp, Ep), x.dtype).at[:B, :E].set(x)
    else:
        xp = x
    if (Cp, Ep) != (C, E):
        wp = jnp.zeros((Cp, Ep), weight.dtype).at[:C, :E].set(weight)
    else:
        wp = weight                      # native [C, E]; no transpose, no copy
    if Cp != C:
        bp = jnp.zeros((1, Cp), bias.dtype).at[0, :C].set(bias)
    else:
        bp = bias.reshape(1, Cp)

    vmem_limit = int(min(max(vmem_budget, usage(tile_m, tile_n, tile_k) + (2 << 20)),
                         vmem_cap - (4 << 20)))

    cost = pl.CostEstimate(
        flops=2 * B * E * C,
        transcendentals=0,
        bytes_accessed=(B * E * x_isz + C * E * w_isz + C * b_isz + B * C * o_isz),
    )

    out_padded = pl.pallas_call(
        _linear_kernel,
        out_shape=jax.ShapeDtypeStruct((Bp, Cp), out_dtype),
        grid_spec=pltpu.PrefetchScalarGridSpec(
            num_scalar_prefetch=0,
            grid=grid,
            in_specs=[
                pl.BlockSpec((tile_m, tile_k), lambda i, j, k: (i, k)),  # x tile
                pl.BlockSpec((tile_n, tile_k), lambda i, j, k: (j, k)),  # W tile (native [C, E])
                pl.BlockSpec((1, tile_n), lambda i, j, k: (0, j)),       # bias tile
            ],
            out_specs=pl.BlockSpec((tile_m, tile_n), lambda i, j, k: (i, j)),
            scratch_shapes=[pltpu.VMEM((tile_m, tile_n), jnp.float32)],
        ),
        compiler_params=pltpu.CompilerParams(
            dimension_semantics=("parallel", "parallel", "arbitrary"),
            vmem_limit_bytes=vmem_limit,
        ),
        cost_estimate=cost,
    )(xp, wp, bp)

    if (Bp, Cp) != (B, C):
        return out_padded[:B, :C]
    return out_padded


if __name__ == "__main__":
    key = jax.random.PRNGKey(0)

    def check(B, E, C, subkey):
        kx, kw, kb = jax.random.split(subkey, 3)
        # Deterministic init mimicking nn.Linear's uniform(-1/sqrt(E), 1/sqrt(E)).
        bound = 1.0 / jnp.sqrt(jnp.float32(E))
        weight = jax.random.uniform(kw, (C, E), jnp.float32, -bound, bound)  # [C, E]
        bias = jax.random.uniform(kb, (C,), jnp.float32, -bound, bound)
        x = jax.random.normal(kx, (B, E), jnp.float32)

        out = jax.block_until_ready(classification_head(x, weight, bias))
        ref = jnp.dot(x, weight.T, precision=jax.lax.Precision.HIGHEST) + bias
        assert out.shape == (B, C)
        assert jnp.allclose(out, ref, atol=1e-4, rtol=1e-4), (B, E, C)

    k1, k2, k3 = jax.random.split(key, 3)
    # Module's toy shape: batch=8, embedding_size=32, num_classes=16.
    check(8, 32, 16, k1)
    # Ragged shape exercising padding on all three dims and the N-axis split.
    check(12, 48, 130, k2)
    # Larger unaligned shape exercising divisor-based tiles and whole-batch M tile.
    check(264, 384, 640, k3)

    print("KERNEL_OK")
</pallas_src>

<mosaic_0001>
module attributes {stable_mosaic.version = 11 : i64} {
  func.func @_linear_kernel(%arg0: i32, %arg1: i32, %arg2: i32, %arg3: memref<8x128xf32, #tpu.memory_space<vmem>>, %arg4: memref<128x128xf32, #tpu.memory_space<vmem>>, %arg5: memref<1x128xf32, #tpu.memory_space<vmem>>, %arg6: memref<8x128xf32, #tpu.memory_space<vmem>>, %arg7: memref<8x128xf32, #tpu.memory_space<vmem>>) attributes {dimension_semantics = [#tpu.dimension_semantics<parallel>, #tpu.dimension_semantics<parallel>, #tpu.dimension_semantics<arbitrary>], iteration_bounds = array<i64: 1, 1, 1>, scalar_prefetch = 0 : i64, scratch_operands = 1 : i64, tpu.core_type = #tpu.core_type<tc>, window_params = [{transform_indices = @transform_0, window_bounds = array<i64: 8, 128>}, {transform_indices = @transform_1, window_bounds = array<i64: 128, 128>}, {transform_indices = @transform_2, window_bounds = array<i64: 1, 128>}, {transform_indices = @transform_3, window_bounds = array<i64: 8, 128>}]} {
    %c0 = arith.constant 0 : index
    %c0_0 = arith.constant 0 : index
    %0 = vector.load %arg3[%c0, %c0_0] : memref<8x128xf32, #tpu.memory_space<vmem>>, vector<8x128xf32>
    %c0_1 = arith.constant 0 : index
    %c0_2 = arith.constant 0 : index
    %1 = vector.load %arg4[%c0_1, %c0_2] : memref<128x128xf32, #tpu.memory_space<vmem>>, vector<128x128xf32>
    %cst = arith.constant dense<0.000000e+00> : vector<8x128xf32>
    %2 = tpu.matmul %0, %1, %cst {dimension_numbers = #tpu.dot_dimension_numbers<[1], [1], [0], [0], [0, 0, 1, 0], [], []>} : vector<8x128xf32>, vector<128x128xf32>, vector<8x128xf32> -> vector<8x128xf32>
    %c0_i32 = arith.constant 0 : i32
    %3 = arith.cmpi eq, %arg2, %c0_i32 : i32
    %4 = arith.extui %3 : i1 to i32
    %c0_i32_3 = arith.constant 0 : i32
    %5 = arith.cmpi ne, %4, %c0_i32_3 : i32
    scf.if %5 {
      %c0_8 = arith.constant 0 : index
      %c0_9 = arith.constant 0 : index
      %12 = vector.load %arg5[%c0_8, %c0_9] : memref<1x128xf32, #tpu.memory_space<vmem>>, vector<1x128xf32>
      %13 = vector.broadcast %12 : vector<1x128xf32> to vector<8x128xf32>
      %14 = arith.addf %2, %13 : vector<8x128xf32>
      %c0_10 = arith.constant 0 : index
      %c0_11 = arith.constant 0 : index
      %15 = vector.load %arg7[%c0_10, %c0_11] : memref<8x128xf32, #tpu.memory_space<vmem>>, vector<8x128xf32>
      tpu.vector_store %arg7[%c0_10, %c0_11], %14 {strides = array<i32>} : memref<8x128xf32, #tpu.memory_space<vmem>>, vector<8x128xf32>,
    } else {
    }
    %c0_i32_4 = arith.constant 0 : i32
    %6 = arith.cmpi sgt, %arg2, %c0_i32_4 : i32
    %7 = arith.extui %6 : i1 to i32
    %c0_i32_5 = arith.constant 0 : i32
    %8 = arith.cmpi ne, %7, %c0_i32_5 : i32
    scf.if %8 {
      %c0_8 = arith.constant 0 : index
      %c0_9 = arith.constant 0 : index
      %12 = vector.load %arg7[%c0_8, %c0_9] : memref<8x128xf32, #tpu.memory_space<vmem>>, vector<8x128xf32>
      %13 = arith.addf %12, %2 : vector<8x128xf32>
      %c0_10 = arith.constant 0 : index
      %c0_11 = arith.constant 0 : index
      %14 = vector.load %arg7[%c0_10, %c0_11] : memref<8x128xf32, #tpu.memory_space<vmem>>, vector<8x128xf32>
      tpu.vector_store %arg7[%c0_10, %c0_11], %13 {strides = array<i32>} : memref<8x128xf32, #tpu.memory_space<vmem>>, vector<8x128xf32>,
    } else {
    }
    %c0_i32_6 = arith.constant 0 : i32
    %9 = arith.cmpi eq, %arg2, %c0_i32_6 : i32
    %10 = arith.extui %9 : i1 to i32
    %c0_i32_7 = arith.constant 0 : i32
    %11 = arith.cmpi ne, %10, %c0_i32_7 : i32
    scf.if %11 {
      %c0_8 = arith.constant 0 : index
      %c0_9 = arith.constant 0 : index
      %12 = vector.load %arg7[%c0_8, %c0_9] : memref<8x128xf32, #tpu.memory_space<vmem>>, vector<8x128xf32>
      %c0_10 = arith.constant 0 : index
      %c0_11 = arith.constant 0 : index
      %13 = vector.load %arg6[%c0_10, %c0_11] : memref<8x128xf32, #tpu.memory_space<vmem>>, vector<8x128xf32>
      tpu.vector_store %arg6[%c0_10, %c0_11], %12 {strides = array<i32>} : memref<8x128xf32, #tpu.memory_space<vmem>>, vector<8x128xf32>,
    } else {
    }
    return
  }
  func.func @transform_0(%arg0: i32, %arg1: i32, %arg2: i32) -> (i32, i32) {
    %c0_i32 = arith.constant 0 : i32
    return %arg0, %arg2 : i32, i32
  }
  func.func @transform_1(%arg0: i32, %arg1: i32, %arg2: i32) -> (i32, i32) {
    %c0_i32 = arith.constant 0 : i32
    return %arg1, %arg2 : i32, i32
  }
  func.func @transform_2(%arg0: i32, %arg1: i32, %arg2: i32) -> (i32, i32) {
    %c0_i32 = arith.constant 0 : i32
    %c0_i32_0 = arith.constant 0 : i32
    return %c0_i32, %arg1 : i32, i32
  }
  func.func @transform_3(%arg0: i32, %arg1: i32, %arg2: i32) -> (i32, i32) {
    %c0_i32 = arith.constant 0 : i32
    return %arg0, %arg1 : i32, i32
  }
}

</mosaic_0001>

<bundles_post_ra>
// kernel: tpu_custom_call.1
= control target key start
LH: loop header
LB: loop body
LE: loop exit
PB: predicated region body
PF: predicated region fallthrough
CT: control target
= control target key end

     0   :  { %8 = vsyncpa [#allocation4], 0  ;;  %s400_s0 = inlined_call_operand.hbm [shape: f32[8,128], index: 0, kind: input, shape index: {}]   ;;  %s401_s1 = inlined_call_operand.hbm [shape: f32[128,128], index: 1, kind: input, shape index: {}]   ;;  %s402_s2 = inlined_call_operand.vmem [shape: f32[1,128], index: 2, kind: input, shape index: {}]   ;;  %s403_s3 = inlined_call_operand.hbm [shape: f32[8,128], index: 3, kind: output, shape index: {}]  }
   0x1   :  { %9 = vsyncpa [#allocation7], 0 }
   0x2   :  { %10 = vsyncpa [#allocation5], 0  ;;  %s326_s12 = smov [#allocation3]   ;;  %s327_s14 = smov [#allocation6]  }
   0x3   :  { %s17_s13 = sshll.u32 %s326_s12, 4  ;;  %s26_s15 = sshll.u32 %s327_s14, 4  ;;  %s18_s13 = int_to_ptr.vmem [resolvable:$true] %s17_s13  ;;  %s354_s15 = int_to_ptr.vmem [resolvable:$true] %s26_s15 }
   0x4   :  { %s254_s18 = scalar_lea.hbm %s400_s0, 128 }
   0x5   :  { %p255_p0 = scmp.ne.s32.totalorder %s400_s0, %s254_s18  ;;  %p258_p1 = scmp.lt.u32.totalorder %s254_s18, %s400_s0 }
   0x7   :  { %p260_p2 = pnand %p258_p1, %p255_p0 }
   0x9   :  { %263 = shalt.err (!%p260_p2)
}
   0xa   :  { %s264_s23 = scalar_lea.vmem %s18_s13, 128  ;;  %p269_p4 = scmp.lt.s32.totalorder %s18_s13, %s18_s13 }
   0xb   :  { %p265_p3 = scmp.ne.s32.totalorder %s18_s13, %s264_s23  ;;  %p270_p5 = scmp.lt.s32.totalorder %s264_s23, %s264_s23 }
   0xd   :  { %p271_p6 = por %p270_p5, %p269_p4 }
   0xf   :  { %p272_p7 = pnand %p271_p6, %p265_p3 }
  0x11   :  { %275 = shalt.err (!%p272_p7)
}
  0x12   :  { %20 = dma.hbm_to_vmem [thread:$0]  %s400_s0, 128, %s18_s13, [#allocation4]  }
  0x13   :  { %s276_s28 = scalar_lea.hbm %s401_s1, 2048 }
  0x14   :  { %p277_p8 = scmp.ne.s32.totalorder %s401_s1, %s276_s28  ;;  %p280_p9 = scmp.lt.u32.totalorder %s276_s28, %s401_s1 }
  0x16   :  { %p282_p10 = pnand %p280_p9, %p277_p8 }
  0x18   :  { %285 = shalt.err (!%p282_p10)
}
  0x19   :  { %s286_s6 = scalar_lea.vmem %s354_s15, 2048  ;;  %p291_p12 = scmp.lt.s32.totalorder %s354_s15, %s354_s15 }
  0x1a   :  { %p287_p11 = scmp.ne.s32.totalorder %s354_s15, %s286_s6  ;;  %p292_p13 = scmp.lt.s32.totalorder %s286_s6, %s286_s6 }
  0x1c   :  { %p293_p0 = por %p292_p13, %p291_p12 }
  0x1e   :  { %p294_p1 = pnand %p293_p0, %p287_p11 }
  0x20   :  { %297 = shalt.err (!%p294_p1)
}
  0x21   :  { %s328_s0 = smov 128   ;;  %s329_s7 = smov 8  }
  0x22   :  { %32 = dma.hbm_to_vmem [thread:$0]  %s401_s1, 2048, %s354_s15, [#allocation7], %s328_s0, %s328_s0, %s329_s7  }
  0x23   :  { %320 = dma.done.wait [#allocation4], 128  }
  0x24   :  { %321 = vsyncadd [#allocation4], 4294967168 }
  0x25   :  { %322 = dma.done.wait [#allocation7], 2048  }
  0x26   :  { %323 = vsyncadd [#allocation7], 4294965248  ;;  %v330_v0 = vmov 0.0|0.0   ;;  %vm331_vm0 = vmmov 0   ;;  %v332_v1 = vmov 0.0   ;;  %v42_v2 = vld [vmem:[#allocation6] sm:$0xff] }
  0x27   :  { %222 = vmatprep.subr.bf16.mxu0 %v330_v0  ;;  %219 = vmatprep.mubr.msk.f32.mxu0 %vm331_vm0, %v332_v1  ;;  %v43_v3 = vld [vmem:[#allocation6 + $0x8] sm:$0xff]  ;;  %v44_v5 = vld [vmem:[#allocation6 + $0x10] sm:$0xff]  ;;  %v45_v6 = vld [vmem:[#allocation6 + $0x18] sm:$0xff]  ;;  %s333_s11 = smov [#allocation8]  }
  0x28   :  { %v223_v4 = vpack.c.bf16 %v43_v3, %v42_v2  ;;  %v226_v7 = vpack.c.bf16 %v45_v6, %v44_v5  ;;  %v46_v8 = vld [vmem:[#allocation6 + $0x20] sm:$0xff]  ;;  %v47_v9 = vld [vmem:[#allocation6 + $0x28] sm:$0xff]  ;;  %v48_v11 = vld [vmem:[#allocation6 + $0x30] sm:$0xff]  ;;  %s159_s12 = sshll.u32 %s333_s11, 4  ;;  %s160_s12 = int_to_ptr.vmem [resolvable:$true] %s159_s12 }
  0x29   :  { %v229_v10 = vpack.c.bf16 %v47_v9, %v46_v8  ;;  %v49_v12 = vld [vmem:[#allocation6 + $0x38] sm:$0xff]  ;;  %v50_v14 = vld [vmem:[#allocation6 + $0x40] sm:$0xff]  ;;  %v51_v15 = vld [vmem:[#allocation6 + $0x48] sm:$0xff]  ;;  %s298_s13 = scalar_lea.vmem %s160_s12, 128  ;;  %p303_p3 = scmp.lt.s32.totalorder %s160_s12, %s160_s12 }
  0x2a   :  { %224 = vmatpush3.bf16.xpose.msra.mxu0 %v223_v4  ;;  %v232_v13 = vpack.c.bf16 %v49_v12, %v48_v11  ;;  %v235_v16 = vpack.c.bf16 %v51_v15, %v50_v14  ;;  %v52_v17 = vld [vmem:[#allocation6 + $0x50] sm:$0xff]  ;;  %v53_v18 = vld [vmem:[#allocation6 + $0x58] sm:$0xff]  ;;  %v54_v20 = vld [vmem:[#allocation6 + $0x60] sm:$0xff]  ;;  %p299_p2 = scmp.ne.s32.totalorder %s160_s12, %s298_s13  ;;  %p304_p4 = scmp.lt.s32.totalorder %s298_s13, %s298_s13 }
  0x2b   :  { %225 = vmatprep.subr.bf16.mxu0 %v330_v0  ;;  %v238_v19 = vpack.c.bf16 %v53_v18, %v52_v17  ;;  %v55_v21 = vld [vmem:[#allocation6 + $0x68] sm:$0xff]  ;;  %v56_v23 = vld [vmem:[#allocation6 + $0x70] sm:$0xff]  ;;  %v57_v24 = vld [vmem:[#allocation6 + $0x78] sm:$0xff] }
  0x2c   :  { %v241_v22 = vpack.c.bf16 %v55_v21, %v54_v20  ;;  %v244_v25 = vpack.c.bf16 %v57_v24, %v56_v23  ;;  %v41_v26 = vld [vmem:[#allocation3] sm:$0xff]  ;;  %p305_p5 = por %p304_p4, %p303_p3 }
  0x2d   :  { %v169_v27 = vld [vmem:[%s402_s2] ss:$0 sm:$0xff] }
  0x2e   :  { %p306_p6 = pnand %p305_p5, %p299_p2 }
  0x32   :  { %227 = vmatpush3.bf16.xpose.msra.mxu0 %v226_v7 }
  0x33   :  { %228 = vmatprep.subr.bf16.mxu0 %v330_v0 }
  0x3a   :  { %230 = vmatpush3.bf16.xpose.msra.mxu0 %v229_v10 }
  0x3b   :  { %231 = vmatprep.subr.bf16.mxu0 %v330_v0 }
  0x42   :  { %233 = vmatpush3.bf16.xpose.msra.mxu0 %v232_v13 }
  0x43   :  { %234 = vmatprep.subr.bf16.mxu0 %v330_v0 }
  0x4a   :  { %236 = vmatpush3.bf16.xpose.msra.mxu0 %v235_v16 }
  0x4b   :  { %237 = vmatprep.subr.bf16.mxu0 %v330_v0 }
  0x52   :  { %239 = vmatpush3.bf16.xpose.msra.mxu0 %v238_v19 }
  0x53   :  { %240 = vmatprep.subr.bf16.mxu0 %v330_v0 }
  0x5a   :  { %242 = vmatpush3.bf16.xpose.msra.mxu0 %v241_v22 }
  0x5b   :  { %243 = vmatprep.subr.bf16.mxu0 %v330_v0 }
  0x62   :  { %245 = vmatpush3.bf16.xpose.msra.mxu0 %v244_v25 }
  0x69   :  { %220 = vmatmul.mubr.f32.vlgmr.msra.gmra.mrb[0].mxu0 %v41_v26 }
 0x13c   :  { %v124_v28 = vpop.f32.mrb[0].mxu0 }
 0x13d   :  { %v139_v29 = vadd.f32 %v169_v27, %v124_v28  ;;  %v221_v30 = vpop.f32.mrb[1].mxu0 }
 0x13f   :  { %152 = vst [vmem:[#allocation8] sm:$0xff] %v139_v29 }
 0x140   :  { %309 = shalt.err (!%p306_p6)
}
 0x141   :  { %s310_s16 = scalar_lea.hbm %s403_s3, 128 }
 0x142   :  { %p311_p7 = scmp.ne.s32.totalorder %s403_s3, %s310_s16  ;;  %p314_p8 = scmp.lt.u32.totalorder %s310_s16, %s403_s3 }
 0x144   :  { %p316_p9 = pnand %p314_p8, %p311_p7 }
 0x146   :  { %319 = shalt.err (!%p316_p9)
}
 0x147   :  { %162 = dma.vmem_to_hbm [thread:$0]  %s160_s12, 128, %s403_s3, [#allocation5]  }
 0x148   :  { %324 = dma.done.wait [#allocation5], 128  }
 0x149   :  { %325 = vsyncadd [#allocation5], 4294967168 }
 0x14a   :  { %166 = vsyncpa [#allocation4], 1 }
 0x14b   :  { %167 = vsyncpa [#allocation7], 1 }
 0x14c   :  { %168 = vsyncpa [#allocation5], 1 }

</bundles_post_ra>
